<compile_context>
chip_gen: v7x
topology: tpu7x:2x2x1
jax: 0.10.0
libtpu: 0.0.40
codegen_flags: <defaults>
</compile_context>

<pallas_src>
import math

import jax
import jax.numpy as jnp
from jax.experimental import pallas as pl
from jax.experimental.pallas import tpu as pltpu


def _round_up(x, m):
    return (x + m - 1) // m * m


def _make_wca_kernel(C, C_pad, k, inv_hw, HW, hw_block, needs_mask):
    p = k // 2

    def kernel(w_ref, x_ref, o_ref, sum_acc, max_acc, pad_buf):
        # w_ref:   (k,)            SMEM conv1d taps (float32)
        # x_ref:   (TB, C, T_HW)   VMEM input tile (input dtype)
        # o_ref:   (TB, 1, C)      VMEM output gate tile (lane-dense)
        # sum_acc: (TB, C) f32     running sum over HW
        # max_acc: (TB, C) f32     running max over HW
        # pad_buf: (TB, C_pad) f32 zero-padded staging buffer for the conv rolls
        hw_i = pl.program_id(1)

        @pl.when(hw_i == 0)
        def _init():
            sum_acc[...] = jnp.zeros_like(sum_acc)
            max_acc[...] = jnp.full_like(max_acc, -jnp.inf)

        xv = x_ref[...]                                   # (TB, C, T_HW), input dtype
        if needs_mask:
            # Last HW block may extend past HW (Pallas pads out-of-bounds reads
            # with unspecified values): mask with 0 for the sum, -inf for the max.
            iota = jax.lax.broadcasted_iota(jnp.int32, (1, 1, hw_block), 2)
            valid = hw_i * hw_block + iota < HW
            x_max = jnp.where(valid, xv, -jnp.inf)
            x_sum = jnp.where(valid, xv, 0)
        else:
            x_max = xv
            x_sum = xv

        # max in the input dtype (exact for bf16), cast only the reduced result;
        # sum accumulates in f32 (cast fused into the sum path only).
        max_acc[...] = jnp.maximum(max_acc[...],
                                   jnp.max(x_max, axis=-1).astype(jnp.float32))
        sum_acc[...] = sum_acc[...] + jnp.sum(x_sum, axis=-1, dtype=jnp.float32)

        @pl.when(hw_i == pl.num_programs(1) - 1)
        def _finalize():
            # conv(avg) + conv(max) == conv(avg + max) since the conv has no bias.
            pooled = sum_acc[...] * inv_hw + max_acc[...]          # (TB, C) f32

            # Stage into a 128-lane-aligned, zero-padded buffer so the rolls act
            # on a native lane width and the padding lanes supply the conv zeros.
            pad_buf[...] = jnp.zeros_like(pad_buf)
            pad_buf[:, 0:C] = pooled
            buf = pad_buf[...]                                      # (TB, C_pad)

            # k-tap zero-padded cross-correlation along channels (lanes):
            #   out[c] = sum_d w[d + p] * pooled_padded[c + d],  d in [-p, p].
            # pltpu.roll(x, s) == np.roll: out[i] = x[(i - s) mod n], so the
            # source offset +d is roll by (C_pad - d) and -d is roll by d.
            # The static masks kill only the circular wrap-around lanes.
            lane = jax.lax.broadcasted_iota(jnp.int32, (1, C_pad), 1)
            out = w_ref[p] * buf                                    # center tap
            for d in range(1, p + 1):
                v_pos = pltpu.roll(buf, C_pad - d, axis=1)          # buf[(c + d) % C_pad]
                out = out + w_ref[p + d] * jnp.where(lane < C_pad - d, v_pos, 0.0)
                v_neg = pltpu.roll(buf, d, axis=1)                  # buf[(c - d) % C_pad]
                out = out + w_ref[p - d] * jnp.where(lane >= d, v_neg, 0.0)

            o_ref[:, 0, :] = jax.nn.sigmoid(out[:, 0:C]).astype(o_ref.dtype)

    return kernel


def window_channel_attention(x_nchw, conv_w, *, batch_block=None, hw_block=None):
    """Forward pass of WindowChannelAttention.

    x_nchw: (B, C, H, W) float32 or bfloat16.
    conv_w: (k,) weights of Conv1d(1, 1, k, padding=k//2, bias=False).
    Returns the sigmoid attention gate of shape (B, C, 1, 1), like the module.
    """
    B, C, H, W = x_nchw.shape
    HW = H * W
    x = x_nchw.reshape(B, C, HW)
    k = int(conv_w.shape[0])
    C_pad = _round_up(C, 128)
    itemsize = jnp.dtype(x.dtype).itemsize

    # --- generation-aware tile budget -------------------------------------
    try:
        info = pltpu.get_tpu_info()
        vmem_cap = int(getattr(info, "vmem_capacity_bytes", 0) or 0)
    except Exception:
        vmem_cap = 0
    if vmem_cap <= 0:
        vmem_cap = 64 << 20            # conservative default: assume small VMEM
    # Small-VMEM chips (v7x: 64 MiB/TC) have 2 TensorCores; 128 MiB chips
    # (v5e/v6e) have one TC, so batch splitting for core parallelism is useless.
    small_vmem_two_tc = vmem_cap <= (96 << 20)
    budget = (12 << 20) if small_vmem_two_tc else (8 << 20)

    # --- HW tiling ---------------------------------------------------------
    if hw_block is None:
        if C * HW * itemsize <= budget:
            hw_block = HW                               # whole row, fully contiguous DMA
        else:
            # Multiple of 128 lanes, floored at >=2 KiB contiguous runs per (b, c) row.
            lane_floor = max(128, _round_up(2048 // itemsize, 128))
            fit = (budget // (C * itemsize)) // 128 * 128
            hw_block = max(lane_floor, fit)
            if hw_block >= HW:
                hw_block = HW
    assert hw_block == HW or hw_block % 128 == 0
    n_hw = pl.cdiv(HW, hw_block)
    needs_mask = (HW % hw_block) != 0

    # --- batch tiling --------------------------------------------------------
    if batch_block is None:
        per_b = C * hw_block * itemsize
        batch_block = max(1, min(B, budget // max(per_b, 1)))
        if small_vmem_two_tc and B >= 2:
            # keep >= 2 batch blocks so both TensorCores get work (v7x only)
            batch_block = min(batch_block, max(1, B // 2))
        while B % batch_block:                          # force an exact grid
            batch_block -= 1
    assert B % batch_block == 0
    grid = (B // batch_block, n_hw)

    # --- derived VMEM limit (2x double-buffered input + output + scratch) ----
    tile_bytes = batch_block * C * hw_block * itemsize
    out_bytes = batch_block * 8 * C_pad * itemsize
    scratch_bytes = 3 * _round_up(batch_block, 8) * C_pad * 4
    needed = 2 * tile_bytes + 2 * out_bytes + scratch_bytes + (2 << 20)
    cap = (40 << 20) if small_vmem_two_tc else (100 << 20)
    vmem_limit = int(min(max(needed, 32 << 20), cap))

    kernel = _make_wca_kernel(C, C_pad, k, 1.0 / HW, HW, hw_block, needs_mask)

    out = pl.pallas_call(
        kernel,
        out_shape=jax.ShapeDtypeStruct((B, 1, C), x.dtype),
        grid=grid,
        in_specs=[
            pl.BlockSpec(memory_space=pltpu.MemorySpace.SMEM),       # conv taps
            pl.BlockSpec((batch_block, C, hw_block), lambda b, h: (b, 0, h)),
        ],
        out_specs=pl.BlockSpec((batch_block, 1, C), lambda b, h: (b, 0, 0)),
        scratch_shapes=[
            pltpu.VMEM((batch_block, C), jnp.float32),      # sum accumulator
            pltpu.VMEM((batch_block, C), jnp.float32),      # max accumulator
            pltpu.VMEM((batch_block, C_pad), jnp.float32),  # conv staging buffer
        ],
        compiler_params=pltpu.CompilerParams(
            dimension_semantics=("parallel", "arbitrary"),
            vmem_limit_bytes=vmem_limit,
        ),
    )(conv_w.astype(jnp.float32), x)

    return out.reshape(B, C, 1, 1)


def _reference(x_nchw, conv_w):
    """Plain-JAX reference mirroring the PyTorch forward exactly."""
    B, C, H, W = x_nchw.shape
    xf = x_nchw.astype(jnp.float32)
    avg = jnp.mean(xf, axis=(2, 3))   # (B, C)
    mx = jnp.max(xf, axis=(2, 3))     # (B, C)
    k = conv_w.shape[0]
    p = k // 2

    def conv1d_channels(v):           # v: (B, C)
        vpad = jnp.pad(v, ((0, 0), (p, p)))
        out = jnp.zeros_like(v)
        for m in range(k):
            out = out + conv_w[m] * vpad[:, m:m + C]
        return out

    gate = jax.nn.sigmoid(conv1d_channels(avg) + conv1d_channels(mx))
    return gate.reshape(B, C, 1, 1).astype(x_nchw.dtype)


if __name__ == "__main__":
    gamma, b_param = 2, 1

    def run_case(key, B, C, H, W, dtype, **kw):
        t = int(abs((math.log(C, 2) + b_param) / gamma))
        k = t if t % 2 else t + 1
        kx, kwt = jax.random.split(key)
        x = jax.random.normal(kx, (B, C, H, W), dtype=jnp.float32).astype(dtype)
        w = jax.random.normal(kwt, (k,), dtype=jnp.float32) * 0.5
        out = jax.block_until_ready(window_channel_attention(x, w, **kw))
        ref = _reference(x, w)
        assert out.shape == (B, C, 1, 1), out.shape
        tol = 2e-2 if dtype == jnp.bfloat16 else 2e-5
        err = float(jnp.max(jnp.abs(out.astype(jnp.float32) - ref.astype(jnp.float32))))
        assert err <= tol, (B, C, H, W, str(dtype), err)

    key = jax.random.PRNGKey(0)
    k1, k2, k3, k4 = jax.random.split(key, 4)

    # C=16 -> k=3; single HW tile, default tiling heuristics.
    run_case(k1, 2, 16, 16, 16, jnp.float32)
    # Tiled HW reduction + multi-batch blocks (HW % hw_block == 0).
    run_case(k2, 4, 32, 32, 32, jnp.float32, batch_block=2, hw_block=256)
    # HW = 400 not a multiple of hw_block: exercises the masked OOB tail block.
    run_case(k3, 2, 16, 20, 20, jnp.float32, hw_block=256)
    # C=4 -> k=1 (no rolls), bf16 input path.
    run_case(k4, 2, 4, 16, 16, jnp.bfloat16)

    print("KERNEL_OK")
</pallas_src>

<mosaic_0001>
module attributes {stable_mosaic.version = 11 : i64} {
  func.func @kernel(%arg0: i32, %arg1: i32, %arg2: memref<3xf32, #tpu.memory_space<smem>>, %arg3: memref<1x16x256xf32, #tpu.memory_space<vmem>>, %arg4: memref<1x1x16xf32, #tpu.memory_space<vmem>>, %arg5: memref<1x16xf32, #tpu.memory_space<vmem>>, %arg6: memref<1x16xf32, #tpu.memory_space<vmem>>, %arg7: memref<1x128xf32, #tpu.memory_space<vmem>>) attributes {dimension_semantics = [#tpu.dimension_semantics<parallel>, #tpu.dimension_semantics<arbitrary>], iteration_bounds = array<i64: 2, 1>, scalar_prefetch = 0 : i64, scratch_operands = 3 : i64, tpu.core_type = #tpu.core_type<tc>, window_params = [{transform_indices = @transform_0, window_bounds = array<i64: 3>}, {transform_indices = @transform_1, window_bounds = array<i64: 1, 16, 256>}, {transform_indices = @transform_2, window_bounds = array<i64: 1, 1, 16>}]} {
    %c0_i32 = arith.constant 0 : i32
    %0 = arith.cmpi eq, %arg1, %c0_i32 : i32
    %1 = arith.extui %0 : i1 to i32
    %c0_i32_0 = arith.constant 0 : i32
    %2 = arith.cmpi ne, %1, %c0_i32_0 : i32
    scf.if %2 {
      %cst_14 = arith.constant 0.000000e+00 : f32
      %15 = vector.broadcast %cst_14 : f32 to vector<1x16xf32>
      %c0_15 = arith.constant 0 : index
      %c0_16 = arith.constant 0 : index
      %16 = vector.load %arg5[%c0_15, %c0_16] : memref<1x16xf32, #tpu.memory_space<vmem>>, vector<1x16xf32>
      tpu.vector_store %arg5[%c0_15, %c0_16], %15 {strides = array<i32>} : memref<1x16xf32, #tpu.memory_space<vmem>>, vector<1x16xf32>,
      %cst_17 = arith.constant 0xFF800000 : f32
      %17 = vector.broadcast %cst_17 : f32 to vector<1x16xf32>
      %c0_18 = arith.constant 0 : index
      %c0_19 = arith.constant 0 : index
      %18 = vector.load %arg6[%c0_18, %c0_19] : memref<1x16xf32, #tpu.memory_space<vmem>>, vector<1x16xf32>
      tpu.vector_store %arg6[%c0_18, %c0_19], %17 {strides = array<i32>} : memref<1x16xf32, #tpu.memory_space<vmem>>, vector<1x16xf32>,
    } else {
    }
    %c0 = arith.constant 0 : index
    %c0_1 = arith.constant 0 : index
    %c0_2 = arith.constant 0 : index
    %3 = vector.load %arg3[%c0, %c0_1, %c0_2] : memref<1x16x256xf32, #tpu.memory_space<vmem>>, vector<1x16x256xf32>
    %c0_3 = arith.constant 0 : index
    %c0_4 = arith.constant 0 : index
    %4 = vector.load %arg6[%c0_3, %c0_4] : memref<1x16xf32, #tpu.memory_space<vmem>>, vector<1x16xf32>
    %cst = arith.constant dense<0xFF800000> : vector<1x16xf32>
    %5 = vector.multi_reduction <maximumf>, %3, %cst [2] : vector<1x16x256xf32> to vector<1x16xf32>
    %6 = arith.maximumf %4, %5 : vector<1x16xf32>
    %c0_5 = arith.constant 0 : index
    %c0_6 = arith.constant 0 : index
    %7 = vector.load %arg6[%c0_5, %c0_6] : memref<1x16xf32, #tpu.memory_space<vmem>>, vector<1x16xf32>
    tpu.vector_store %arg6[%c0_5, %c0_6], %6 {strides = array<i32>} : memref<1x16xf32, #tpu.memory_space<vmem>>, vector<1x16xf32>,
    %c0_7 = arith.constant 0 : index
    %c0_8 = arith.constant 0 : index
    %8 = vector.load %arg5[%c0_7, %c0_8] : memref<1x16xf32, #tpu.memory_space<vmem>>, vector<1x16xf32>
    %cst_9 = arith.constant dense<0.000000e+00> : vector<1x16xf32>
    %9 = vector.multi_reduction <add>, %3, %cst_9 [2] : vector<1x16x256xf32> to vector<1x16xf32>
    %10 = arith.addf %8, %9 : vector<1x16xf32>
    %c0_10 = arith.constant 0 : index
    %c0_11 = arith.constant 0 : index
    %11 = vector.load %arg5[%c0_10, %c0_11] : memref<1x16xf32, #tpu.memory_space<vmem>>, vector<1x16xf32>
    tpu.vector_store %arg5[%c0_10, %c0_11], %10 {strides = array<i32>} : memref<1x16xf32, #tpu.memory_space<vmem>>, vector<1x16xf32>,
    %c0_i32_12 = arith.constant 0 : i32
    %12 = arith.cmpi eq, %arg1, %c0_i32_12 : i32
    %13 = arith.extui %12 : i1 to i32
    %c0_i32_13 = arith.constant 0 : i32
    %14 = arith.cmpi ne, %13, %c0_i32_13 : i32
    scf.if %14 {
      %c0_14 = arith.constant 0 : index
      %c0_15 = arith.constant 0 : index
      %15 = vector.load %arg5[%c0_14, %c0_15] : memref<1x16xf32, #tpu.memory_space<vmem>>, vector<1x16xf32>
      %cst_16 = arith.constant 3.906250e-03 : f32
      %16 = vector.broadcast %cst_16 : f32 to vector<1x16xf32>
      %17 = arith.mulf %15, %16 : vector<1x16xf32>
      %c0_17 = arith.constant 0 : index
      %c0_18 = arith.constant 0 : index
      %18 = vector.load %arg6[%c0_17, %c0_18] : memref<1x16xf32, #tpu.memory_space<vmem>>, vector<1x16xf32>
      %19 = arith.addf %17, %18 : vector<1x16xf32>
      %cst_19 = arith.constant 0.000000e+00 : f32
      %20 = vector.broadcast %cst_19 : f32 to vector<1x128xf32>
      %c0_20 = arith.constant 0 : index
      %c0_21 = arith.constant 0 : index
      %21 = vector.load %arg7[%c0_20, %c0_21] : memref<1x128xf32, #tpu.memory_space<vmem>>, vector<1x128xf32>
      tpu.vector_store %arg7[%c0_20, %c0_21], %20 {strides = array<i32>} : memref<1x128xf32, #tpu.memory_space<vmem>>, vector<1x128xf32>,
      %c0_22 = arith.constant 0 : index
      %c0_23 = arith.constant 0 : index
      %22 = vector.load %arg7[%c0_22, %c0_23] : memref<1x128xf32, #tpu.memory_space<vmem>>, vector<1x16xf32>
      tpu.vector_store %arg7[%c0_22, %c0_23], %19 {strides = array<i32>} : memref<1x128xf32, #tpu.memory_space<vmem>>, vector<1x16xf32>,
      %c0_24 = arith.constant 0 : index
      %c0_25 = arith.constant 0 : index
      %23 = vector.load %arg7[%c0_24, %c0_25] : memref<1x128xf32, #tpu.memory_space<vmem>>, vector<1x128xf32>
      %24 = tpu.iota {dimensions = array<i32: 1>} : vector<1x128xi32>
      %c1 = arith.constant 1 : index
      %25 = memref.load %arg2[%c1] : memref<3xf32, #tpu.memory_space<smem>>
      %26 = vector.broadcast %25 : f32 to vector<1x128xf32>
      %27 = arith.mulf %26, %23 : vector<1x128xf32>
      %c127_i32 = arith.constant 127 : i32
      %28 = tpu.dynamic_rotate %23 by %c127_i32 dim 1 : vector<1x128xf32>, i32 -> vector<1x128xf32>
      %c2 = arith.constant 2 : index
      %29 = memref.load %arg2[%c2] : memref<3xf32, #tpu.memory_space<smem>>
      %c127_i32_26 = arith.constant 127 : i32
      %30 = vector.broadcast %c127_i32_26 : i32 to vector<1x128xi32>
      %31 = arith.cmpi slt, %24, %30 : vector<1x128xi32>
      %cst_27 = arith.constant 0.000000e+00 : f32
      %32 = vector.broadcast %cst_27 : f32 to vector<1x128xf32>
      %33 = arith.select %31, %28, %32 : vector<1x128xi1>, vector<1x128xf32>
      %34 = vector.broadcast %29 : f32 to vector<1x128xf32>
      %35 = arith.mulf %34, %33 : vector<1x128xf32>
      %36 = arith.addf %27, %35 : vector<1x128xf32>
      %c1_i32 = arith.constant 1 : i32
      %37 = tpu.dynamic_rotate %23 by %c1_i32 dim 1 : vector<1x128xf32>, i32 -> vector<1x128xf32>
      %c0_28 = arith.constant 0 : index
      %38 = memref.load %arg2[%c0_28] : memref<3xf32, #tpu.memory_space<smem>>
      %c1_i32_29 = arith.constant 1 : i32
      %39 = vector.broadcast %c1_i32_29 : i32 to vector<1x128xi32>
      %40 = arith.cmpi sge, %24, %39 : vector<1x128xi32>
      %cst_30 = arith.constant 0.000000e+00 : f32
      %41 = vector.broadcast %cst_30 : f32 to vector<1x128xf32>
      %42 = arith.select %40, %37, %41 : vector<1x128xi1>, vector<1x128xf32>
      %43 = vector.broadcast %38 : f32 to vector<1x128xf32>
      %44 = arith.mulf %43, %42 : vector<1x128xf32>
      %45 = arith.addf %36, %44 : vector<1x128xf32>
      %46 = vector.extract_strided_slice %45 {offsets = [0, 0], sizes = [1, 16], strides = [1, 1]} : vector<1x128xf32> to vector<1x16xf32>
      %47 = arith.negf %46 : vector<1x16xf32>
      %48 = math.exp %47 : vector<1x16xf32>
      %cst_31 = arith.constant 1.000000e+00 : f32
      %49 = vector.broadcast %cst_31 : f32 to vector<1x16xf32>
      %50 = arith.addf %49, %48 : vector<1x16xf32>
      %51 = arith.divf %49, %50 : vector<1x16xf32>
      %c0_32 = arith.constant 0 : index
      %c0_33 = arith.constant 0 : index
      %c0_34 = arith.constant 0 : index
      %52 = vector.load %arg4[%c0_32, %c0_33, %c0_34] : memref<1x1x16xf32, #tpu.memory_space<vmem>>, vector<1x1x16xf32>
      %53 = vector.shape_cast %52 : vector<1x1x16xf32> to vector<1x16xf32>
      %54 = vector.shape_cast %51 : vector<1x16xf32> to vector<1x1x16xf32>
      tpu.vector_store %arg4[%c0_32, %c0_33, %c0_34], %54 {strides = array<i32>} : memref<1x1x16xf32, #tpu.memory_space<vmem>>, vector<1x1x16xf32>,
    } else {
    }
    return
  }
  func.func @transform_0(%arg0: i32, %arg1: i32) -> i32 {
    %c0_i32 = arith.constant 0 : i32
    %c0_i32_0 = arith.constant 0 : i32
    return %c0_i32 : i32
  }
  func.func @transform_1(%arg0: i32, %arg1: i32) -> (i32, i32, i32) {
    %c0_i32 = arith.constant 0 : i32
    %c0_i32_0 = arith.constant 0 : i32
    return %arg0, %c0_i32, %arg1 : i32, i32, i32
  }
  func.func @transform_2(%arg0: i32, %arg1: i32) -> (i32, i32, i32) {
    %c0_i32 = arith.constant 0 : i32
    %c0_i32_0 = arith.constant 0 : i32
    %c0_i32_1 = arith.constant 0 : i32
    return %arg0, %c0_i32, %c0_i32_0 : i32, i32, i32
  }
}

</mosaic_0001>

<bundles_post_ra>
// kernel: tpu_custom_call.1
= control target key start
LH: loop header
LB: loop body
LE: loop exit
PB: predicated region body
PF: predicated region fallthrough
CT: control target
= control target key end

     0   :  { %7 = vsyncpa [#allocation8], 0  ;;  %s1311_s0 = inlined_call_operand.hbm [shape: f32[3], index: 0, kind: input, shape index: {}]   ;;  %s1312_s1 = inlined_call_operand.hbm [shape: f32[2,16,256], index: 1, kind: input, shape index: {}]   ;;  %s1313_s2 = inlined_call_operand.hbm [shape: f32[2,1,16], index: 2, kind: output, shape index: {}]  }
   0x1   :  { %8 = vsyncpa [#allocation6], 0 }
   0x2   :  { %10 = vsyncpa [#allocation6 + $0x1], 0 }
   0x3   :  { %11 = vsyncpa [#allocation7], 0 }
   0x4   :  { %13 = vsyncpa [#allocation7 + $0x1], 0  ;;  %s1012_s9 = smov 0   ;;  %s1014_s10 = smov 0  }
   0x5   :  { %s1016_s11 = smov 0   ;;  %s1018_s12 = smov 0  }
   0x6   :  { %s1020_s13 = smov 0   ;;  %s1022_s14 = smov 0  }
   0x7 LB: > { %s750_s15 = sadd.s32 4294967295, %s984_s14   ;;  %s751_s16 = sadd.s32 4294967294, %s984_s14   ;;  %s984_s14 = sphi %s1022_s14, %s19_s14   ;;  %s980_s13 = sphi %s1020_s13, %s1333_s13   ;;  %s976_s12 = sphi %s1018_s12, %s1332_s12   ;;  %s972_s11 = sphi %s1016_s11, %s1331_s11   ;;  %s968_s10 = sphi %s1014_s10, %s1330_s10   ;;  %s964_s9 = sphi %s1012_s9, %s1329_s9  }
   0x8   : > { %s61_s17 = sadd.s32 1, %s972_s11  ;;  %p68_p0 = scmp.ne.s32.totalorder %s972_s11, %s968_s10 }
   0x9   : > { %p69_p1 = scmp.eq.s32.totalorder %s984_s14, 0  ;;  %p74_p2 = scmp.ne.s32.totalorder %s968_s10, %s964_s9 }
   0xa   : > { %p1050_p3 = scmp.eq.s32.totalorder %s750_s15, 0  ;;  %p98_p4 = scmp.eq.s32.totalorder %s750_s15, 1 }
   0xb   : > { %p70_p5 = por %p69_p1, %p68_p0  ;;  %p104_p6 = scmp.eq.s32.totalorder %s751_s16, 1 }
   0xc   : > { %s1318_s18 = scalar_select %p1050_p3, 1, 0 }
   0xd   : > { %p1056_p7 = por %p1050_p3, %p74_p2  ;;  %p1060_p8 = por %p98_p4, %p68_p0 }
   0xe   : > { %p1064_p9 = por %p104_p6, %p74_p2  ;;  %p752_p10 = scmp.ge.s32.totalorder %s984_s14, 1 }
   0xf   : > { %s1319_s19 = scalar_select %p1056_p7, 1, 0 }
  0x10   : > { %s1320_s20 = scalar_select %p1060_p8, 1, 0 }
  0x11   : > { %s1321_s21 = scalar_select %p1064_p9, 1, 0 }
  0x12   : > { %p111_p11 = scmp.lt.s32.totalorder %s984_s14, 3  ;;  %p789_p1 = scmp.lt.s32.totalorder %s984_s14, 2 }
  0x13   : > { %s133_s23 = sand.u32 1, %s972_s11   ;;  %s31_s25 = sadd.s32 1, %s980_s13 }
  0x14   : > { %p1071_p13 = pnand %p752_p10, %p111_p11  ;;  %p1079_p0 = pnand %p789_p1, %p70_p5 }
  0x15   : > { %s755_s26 = sshll.u32 %s133_s23, 5  ;;  %p33_p4 = scmp.ge.s32.totalorder %s31_s25, 2 }
  0x16   : > { %p776_p7 = pneg %p1071_p13  ;;  %s855_s29 = scalar_lea.hbm %s1311_s0, 16 }
  0x17   : > { %p856_p6 = scmp.ne.s32.totalorder %s1311_s0, %s855_s29  ;;  %p862_p5 = scmp.lt.u32.totalorder %s855_s29, %s1311_s0 }
  0x18   : > { %p777_p2 = pnand %p776_p7, %p1050_p3 }
  0x1a   : > { %p857_p10 = pneg %p777_p2 }
  0x1c   : > { %p858_p11 = pnand %p857_p10, %p856_p6 }
  0x1e   : > { %p859_p12 = pneg %p858_p11 }
  0x20   : > { %p864_p1 = pnand %p862_p5, %p859_p12 }
  0x22   : > { %867 = shalt.err (!%p864_p1)
}
  0x23   : > { %s986_s6 = smov [#allocation5]   ;;  %s1335_s25 = smov (%p33_p4, %s31_s25), 0 }
  0x24   : > { %779 = dma.hbm_to_smem (!%p777_p2), %s1311_s0, 16, %s986_s6, [#allocation8]  }
  0x25   : > { %s767_s15 = sshll.u32 %s980_s13, 9  ;;  %s56_s16 = ssub.s32 %s980_s13, %s1335_s25 }
  0x26   : > { %s1106_s29 = scalar_lea.hbm %s1312_s1, %s767_s15  ;;  %p59_p7 = scmp.eq.s32.totalorder %s56_s16, 0 }
  0x27   : > { %s137_s30 = scalar_lea.vmem [#allocation9], %s755_s26  ;;  %s1115_s5 = scalar_lea.sflag [#allocation6], %s133_s23 }
  0x28   : > { %s146_s3 = sshll.u32 %s137_s30, 4  ;;  %s868_s6 = scalar_lea.hbm %s1106_s29, 512  ;;  %s1108_s3 = int_to_ptr.vmem [resolvable:$true] %s146_s3 }
  0x29   : > { %s1113_s4 = scalar_select %p59_p7, %s972_s11, %s61_s17  }
  0x2a   : > { %p869_p12 = scmp.ne.s32.totalorder %s1106_s29, %s868_s6  ;;  %p870_p2 = pneg %p1079_p0 }
  0x2b   : > { %s873_s26 = scalar_lea.hbm %s1312_s1, 1024  ;;  %p874_p10 = scmp.lt.u32.totalorder %s1106_s29, %s1312_s1 }
  0x2c   : > { %p871_p4 = pnand %p870_p2, %p869_p12  ;;  %p875_p11 = scmp.lt.u32.totalorder %s873_s26, %s868_s6 }
  0x2d   : > { %p877_p1 = scmp.lt.u32.totalorder %s868_s6, %s1106_s29 }
  0x2e   : > { %p872_p6 = pneg %p871_p4  ;;  %p876_p5 = por %p875_p11, %p874_p10 }
  0x30   : > { %p878_p7 = por %p877_p1, %p876_p5 }
  0x32   : > { %p879_p9 = pnand %p878_p7, %p872_p6 }
  0x34   : > { %882 = shalt.err (!%p879_p9)
}
  0x35   : > { %s883_s17 = scalar_lea.vmem %s1108_s3, 512  ;;  %s987_s23 = smov [#allocation9]  }
  0x36   : > { %p884_p12 = scmp.ne.s32.totalorder %s1108_s3, %s883_s17  ;;  %s888_s27 = sshll.u32 %s987_s23, 4  ;;  %s889_s27 = int_to_ptr.vmem [resolvable:$false] %s888_s27 }
  0x37   : > { %s890_s28 = scalar_lea.vmem %s889_s27, 1024  ;;  %p891_p3 = scmp.lt.s32.totalorder %s1108_s3, %s889_s27 }
  0x38   : > { %p886_p4 = pnand %p884_p12, %p870_p2  ;;  %p892_p10 = scmp.lt.s32.totalorder %s890_s28, %s883_s17 }
  0x3a   : > { %p887_p8 = pneg %p886_p4  ;;  %p893_p11 = por %p892_p10, %p891_p3 }
  0x3c   : > { %p894_p5 = pnand %p893_p11, %p887_p8 }
  0x3e   : > { %897 = shalt.err (!%p894_p5)
}
  0x3f   : > { %s988_s30 = smov 256   ;;  %s989_s6 = smov 16  }
  0x40   : > { %783 = dma.hbm_to_vmem [thread:$0]  (!%p1079_p0), %s1106_s29, 512, %s1108_s3, %s1115_s5, %s988_s30, %s988_s30, %s989_s6  }
  0x41   : > { %158 = sbr.rel (%p1071_p13) target bundleno = 571 (0x23b), region = 28  ;;  %p1324_p9 = scmp.ne.s32.totalorder (!%p1071_p13), %s1318_s18, 0 }
  0x48   : > { %951 = dma.done.wait (%p1324_p9), [#allocation8], 16  }
  0x49   : > { %953 = vsyncadd (%p1324_p9), [#allocation8], 4294967280  ;;  %s1150_s7 = sand.u32 1, %s968_s10   ;;  %p1325_p3 = scmp.ne.s32.totalorder %s1319_s19, 0 }
  0x4a   : > { %s760_s8 = sshll.u32 %s1150_s7, 5  ;;  %s165_s26 = scalar_lea.sflag [#allocation6], %s1150_s7 }
  0x4b   : > { %s168_s15 = scalar_lea.vmem [#allocation9], %s760_s8 }
  0x4c   : > { %955 = dma.done.wait (%p1325_p3), %s165_s26, 512  }
  0x4d   : > { %957 = vsyncadd (%p1325_p3), %s165_s26, 4294966784 }
  0x4e   : > { %173 = sfence }
  0x4f   : > { %v197_v0 = vld [vmem:[%s168_s15] sm:$0xff]  ;;  %v198_v1 = vld [vmem:[%s168_s15 + $0x8] sm:$0xff]  ;;  %v199_v2 = vld [vmem:[%s168_s15 + $0x10] sm:$0xff]  ;;  %v990_v8 = vmov 0   ;;  %v210_v9 = vlaneseq  ;;  %v991_v10 = vmov 1966171168  }
  0x50   : > { %v410_v3 = vadd.f32 %v198_v1, %v197_v0  ;;  %v200_v4 = vld [vmem:[%s168_s15 + $0x18] sm:$0xff]  ;;  %v202_v5 = vmax.f32 %v197_v0, %v198_v1  ;;  %849 = vset.pattern.permute.xlu0 %v990_v8  ;;  %850 = vset.pattern.permute.xlu1 %v990_v8  ;;  %v279_v11 = vunpack.c.l.s4 %v991_v10  ;;  %vm194_vm0 = vcmask 122880   ;;  %s994_s18 = smov 127   ;;  %s995_s19 = smov 1  }
  0x51   : > { %v413_v6 = vadd.f32 %v200_v4, %v199_v2  ;;  %v205_v7 = vmax.f32 %v199_v2, %v200_v4  ;;  %v1159_v12 = vshrl.u32 %v210_v9, 7  ;;  %vm389_vm1 = vcmask 130112   ;;  %s762_s22 = sld [smem:[#allocation5 + $0x2]]  ;;  %s761_s24 = sld [smem:[#allocation5 + $0x1]] }
  0x52   : > { %411 = vadd.xlane.f32.xlu0 %v410_v3  ;;  %203 = vmax.xlane.f32.xlu1 %v202_v5  ;;  %v280_v13 = vunpack.c.0.s8 %v279_v11  ;;  %s635_s29 = sld [smem:[#allocation5]]  ;;  %s764_s3 = sshll.u32 %s976_s12, 4 }
  0x53   : > { %v1162_v14 = vsub.s32 0, %v1159_v12  ;;  %v1165_v15 = vsub.s32 1, %v1159_v12  ;;  %v1168_v16 = vsub.s32 2, %v1159_v12  ;;  %v1171_v17 = vsub.s32 3, %v1159_v12  ;;  %s188_s5 = scalar_lea.vmem [#allocation10], %s1150_s7  ;;  %s1261_s27 = scalar_lea.hbm %s1313_s2, %s764_s3 }
  0x54   : > { %v1174_v18 = vsub.s32 4, %v1159_v12  ;;  %v1177_v19 = vsub.s32 5, %v1159_v12  ;;  %v1180_v20 = vsub.s32 6, %v1159_v12  ;;  %v1183_v21 = vsub.s32 7, %v1159_v12  ;;  %s661_s16 = sshll.u32 %s188_s5, 4  ;;  %s649_s28 = scalar_lea.sflag [#allocation7], %s1150_s7  ;;  %s1263_s16 = int_to_ptr.vmem [resolvable:$true] %s661_s16 }
  0x55   : > { %v1186_v24 = vsub.s32 %v280_v13, %v1159_v12  ;;  %s898_s30 = scalar_lea.vmem %s1263_s16, 16  ;;  %p1326_p13 = scmp.ne.s32.totalorder %s1320_s20, 0 }
  0x56   : > { %414 = vadd.xlane.f32.xlu0 %v413_v6  ;;  %206 = vmax.xlane.f32.xlu1 %v205_v7  ;;  %p899_p8 = scmp.ne.s32.totalorder %s1263_s16, %s898_s30  ;;  %s996_s12 = smov [#allocation10]  }
  0x57   : > { %s902_s6 = sshll.u32 %s996_s12, 4  ;;  %s903_s6 = int_to_ptr.vmem [resolvable:$false] %s902_s6 }
  0x58   : > { %p900_p0 = pnand %p899_p8, %p1326_p13  ;;  %s904_s8 = scalar_lea.vmem %s903_s6, 32 }
  0x59   : > { %p905_p6 = scmp.lt.s32.totalorder %s1263_s16, %s903_s6  ;;  %p906_p1 = scmp.lt.s32.totalorder %s904_s8, %s898_s30 }
  0x5a   : > { %p901_p2 = pneg %p900_p0 }
  0x5b   : > { %p907_p7 = por %p906_p1, %p905_p6 }
  0x5d   : > { %p908_p12 = pnand %p907_p7, %p901_p2 }
  0xdf   : > { %v412_v22 = vpop.xlane.xlu0 %411  ;;  %v204_v23 = vpop.xlane.xlu1 %203 }
  0xe0   : > { %v421_v25 = vrot.slane %v412_v22, %v1162_v14  ;;  %v425_v26 = vrot.slane %v412_v22, %v1165_v15  ;;  %v429_v27 = vrot.slane %v412_v22, %v1168_v16  ;;  %v433_v28 = vrot.slane %v412_v22, %v1171_v17 }
  0xe1   : > { %v437_v29 = vrot.slane %v412_v22, %v1174_v18  ;;  %v441_v30 = vrot.slane %v412_v22, %v1177_v19  ;;  %v445_v31 = vrot.slane %v412_v22, %v1180_v20  ;;  %v449_v32 = vrot.slane %v412_v22, %v1183_v21 }
  0xe2   : > { %v482_v33 = vcombine.low %v421_v25, %v425_v26  ;;  %v483_v34 = vcombine.low %v429_v27, %v433_v28  ;;  %v213_v35 = vrot.slane %v204_v23, %v1162_v14  ;;  %v217_v36 = vrot.slane %v204_v23, %v1165_v15 }
  0xe3   : > { %v415_v37 = vpop.xlane.xlu0 %414  ;;  %v484_v38 = vcombine.low %v437_v29, %v441_v30  ;;  %v485_v39 = vcombine.low %v445_v31, %v449_v32  ;;  %v221_v40 = vrot.slane %v204_v23, %v1168_v16  ;;  %v225_v41 = vrot.slane %v204_v23, %v1171_v17  ;;  %v207_v62 = vpop.xlane.xlu1 %206 }
  0xe4   : > { %v492_v42 = vrot.slane %v482_v33, %v1186_v24  ;;  %v499_v43 = vrot.slane %v483_v34, %v1186_v24  ;;  %v453_v44 = vrot.slane %v415_v37, %v1162_v14  ;;  %v457_v45 = vrot.slane %v415_v37, %v1165_v15 }
  0xe5   : > { %v506_v46 = vrot.slane %v484_v38, %v1186_v24  ;;  %v513_v47 = vrot.slane %v485_v39, %v1186_v24  ;;  %v461_v48 = vrot.slane %v415_v37, %v1168_v16  ;;  %v465_v49 = vrot.slane %v415_v37, %v1171_v17 }
  0xe6   : > { %v514_v50 = vcombine.low %v492_v42, %v499_v43  ;;  %v469_v51 = vrot.slane %v415_v37, %v1174_v18  ;;  %v473_v52 = vrot.slane %v415_v37, %v1177_v19  ;;  %v477_v53 = vrot.slane %v415_v37, %v1180_v20 }
  0xe7   : > { %v515_v54 = vcombine.low %v506_v46, %v513_v47  ;;  %v481_v55 = vrot.slane %v415_v37, %v1183_v21  ;;  %v531_v56 = vcombine.low %v453_v44, %v457_v45  ;;  %v532_v57 = vcombine.low %v461_v48, %v465_v49 }
  0xe8   : > { %v522_v58 = vrot.slane %v514_v50, %v1186_v24  ;;  %v533_v59 = vcombine.low %v469_v51, %v473_v52  ;;  %v229_v60 = vrot.slane %v204_v23, %v1174_v18  ;;  %v233_v61 = vrot.slane %v204_v23, %v1177_v19 }
  0xe9   : > { %v529_v63 = vrot.slane %v515_v54, %v1186_v24  ;;  %v534_v0 = vcombine.low %v477_v53, %v481_v55  ;;  %v541_v1 = vrot.slane %v531_v56, %v1186_v24  ;;  %v548_v2 = vrot.slane %v532_v57, %v1186_v24 }
  0xea   : > { %v555_v3 = vrot.slane %v533_v59, %v1186_v24  ;;  %v237_v4 = vrot.slane %v204_v23, %v1180_v20  ;;  %v241_v5 = vrot.slane %v204_v23, %v1183_v21  ;;  %v274_v6 = vcombine.low %v213_v35, %v217_v36 }
  0xeb   : > { %v530_v7 = vcombine.low %v522_v58, %v529_v63  ;;  %v562_v8 = vrot.slane %v534_v0, %v1186_v24  ;;  %v563_v10 = vcombine.low %v541_v1, %v548_v2  ;;  %v275_v11 = vcombine.low %v221_v40, %v225_v41 }
  0xec   : > { %v276_v13 = vcombine.low %v229_v60, %v233_v61  ;;  %v277_v22 = vcombine.low %v237_v4, %v241_v5  ;;  %v284_v25 = vrot.slane %v274_v6, %v1186_v24  ;;  %v245_v26 = vrot.slane %v207_v62, %v1162_v14 }
  0xed   : > { %581 = vperm.xlu0 %849, %v530_v7   ;;  %v564_v27 = vcombine.low %v555_v3, %v562_v8  ;;  %v571_v28 = vrot.slane %v563_v10, %v1186_v24  ;;  %v291_v29 = vrot.slane %v275_v11, %v1186_v24  ;;  %v249_v23 = vrot.slane %v207_v62, %v1165_v15 }
  0xee   : > { %v298_v30 = vrot.slane %v276_v13, %v1186_v24  ;;  %v305_v31 = vrot.slane %v277_v22, %v1186_v24  ;;  %v253_v32 = vrot.slane %v207_v62, %v1168_v16  ;;  %v257_v33 = vrot.slane %v207_v62, %v1171_v17 }
  0xef   : > { %v578_v34 = vrot.slane %v564_v27, %v1186_v24  ;;  %v306_v35 = vcombine.low %v284_v25, %v291_v29  ;;  %v261_v14 = vrot.slane %v207_v62, %v1174_v18  ;;  %v265_v36 = vrot.slane %v207_v62, %v1177_v19 }
  0xf0   : > { %v307_v37 = vcombine.low %v298_v30, %v305_v31  ;;  %v269_v38 = vrot.slane %v207_v62, %v1180_v20  ;;  %v273_v15 = vrot.slane %v207_v62, %v1183_v21  ;;  %v323_v39 = vcombine.low %v245_v26, %v249_v23 }
  0xf1   : > { %v579_v40 = vcombine.low %v571_v28, %v578_v34  ;;  %v314_v41 = vrot.slane %v306_v35, %v1186_v24  ;;  %v324_v42 = vcombine.low %v253_v32, %v257_v33  ;;  %v325_v16 = vcombine.low %v261_v14, %v265_v36 }
  0xf2   : > { %v321_v17 = vrot.slane %v307_v37, %v1186_v24  ;;  %v326_v43 = vcombine.low %v269_v38, %v273_v15  ;;  %v333_v44 = vrot.slane %v323_v39, %v1186_v24  ;;  %v992_v46 = vmov 0.0  }
  0xf3   : > { %584 = vperm.xlu1 %850, %v579_v40   ;;  %v340_v18 = vrot.slane %v324_v42, %v1186_v24  ;;  %v347_v19 = vrot.slane %v325_v16, %v1186_v24  ;;  %195 = vst.msk [vmem:[#allocation2] sm:$0x1] %vm194_vm0, %v992_v46  ;;  %619 = vst [vmem:[#allocation4] sm:$0x1] %v992_v46  ;;  %v993_v51 = vmov -inf   ;;  %v379_v52 = vand.u32 127, %v210_v9 }
  0xf4   : > { %v322_v20 = vcombine.low %v314_v41, %v321_v17  ;;  %v354_v21 = vrot.slane %v326_v43, %v1186_v24  ;;  %196 = vst.msk [vmem:[#allocation3] sm:$0x1] %vm194_vm0, %v993_v51  ;;  %v630_v25 = vstv %s762_s22  ;;  %v623_v26 = vstv %s761_s24 }
  0xf5   : > { %v355_v45 = vcombine.low %v333_v44, %v340_v18  ;;  %v384_v53 = vadd.s32 4294967288, %v379_v52  ;;  %v382_v54 = vsub.s32 %v379_v52, %v1159_v12  ;;  %vm628_vm2 = vcmp.lt.s32.totalorder %v379_v52, 127 }
  0xf6   : > { %v356_v47 = vcombine.low %v347_v19, %v354_v21  ;;  %vm636_vm3 = vcmp.ge.s32.totalorder %v379_v52, 1  ;;  %v638_v29 = vstv %s635_s29 }
  0xf7   : > { %373 = vperm.xlu1 %850, %v322_v20   ;;  %v363_v48 = vrot.slane %v355_v45, %v1186_v24  ;;  %v387_v55 = vsub.s32 %v384_v53, %v1159_v12 }
  0xf8   : > { %v370_v49 = vrot.slane %v356_v47, %v1186_v24 }
  0xfa   : > { %v371_v50 = vcombine.low %v363_v48, %v370_v49  ;;  %v409_v63 = vld [vmem:[#allocation2] sm:$0x1] }
  0xfb   : > { %v201_v5 = vld [vmem:[#allocation3] sm:$0x1] }
  0xfc   : > { %376 = vperm.xlu1 %850, %v371_v50  }
 0x16c   : > { %v582_v56 = vpop.permute.xlu0 %581 }
 0x16d   : > { %v589_v58 = vrot.slane %v582_v56, %v382_v54 }
 0x172   : > { %v585_v57 = vpop.permute.xlu1 %584 }
 0x173   : > { %v593_v59 = vrot.slane %v585_v57, %v387_v55 }
 0x175   : > { %v594_v60 = vsel %vm389_vm1, %v593_v59, %v589_v58 }
 0x176   : > { %v601_v61 = vrot.slane %v594_v60, %v1186_v24  ;;  %v374_v62 = vpop.permute.xlu1 %373 }
 0x177   : > { %v383_v9 = vrot.slane %v374_v62, %v382_v54 }
 0x178   : > { %v608_v0 = vrot.slane %v601_v61, %v1186_v24 }
 0x17a   : > { %v610_v1 = vadd.f32 %v608_v0, %v409_v63 }
 0x17b   : > { %v377_v2 = vpop.permute.xlu1 %376 }
 0x17c   : > { %611 = vst.msk [vmem:[#allocation2] sm:$0x1] %vm194_vm0, %v610_v1  ;;  %v388_v3 = vrot.slane %v377_v2, %v387_v55 }
 0x17e   : > { %v390_v4 = vsel %vm389_vm1, %v388_v3, %v383_v9 }
 0x17f   : > { %v397_v12 = vrot.slane %v390_v4, %v1186_v24 }
 0x181   : > { %v404_v6 = vrot.slane %v397_v12, %v1186_v24 }
 0x183   : > { %v406_v7 = vmax.f32 %v201_v5, %v404_v6  ;;  %v615_v8 = vld [vmem:[#allocation2] sm:$0x1] }
 0x184   : > { %v616_v10 = vmul.f32 0.00390625, %v615_v8 }
 0x185   : > { %408 = vst.msk [vmem:[#allocation3] sm:$0x1] %vm194_vm0, %v406_v7 }
 0x18c   : > { %v617_v11 = vld [vmem:[#allocation3] sm:$0x1] }
 0x18d   : > { %v618_v13 = vadd.f32 %v617_v11, %v616_v10 }
 0x18f   : > { %620 = vst.msk [vmem:[#allocation4] sm:$0x1] %vm194_vm0, %v618_v13 }
 0x196   : > { %v621_v22 = vld [vmem:[#allocation4] sm:$0x1] }
 0x197   : > { %625 = vrot.lane.b32.xlu1 %v621_v22, %s994_s18  ;;  %v624_v23 = vmul.f32 %v623_v26, %v621_v22 }
 0x19b   : > { %633 = vrot.lane.b32.xlu1 %v621_v22, %s995_s19 }
 0x209   : > { %v626_v24 = vpop.permute.xlu1 %625 }
 0x20a   : > { %v629_v27 = vsel %vm628_vm2, %v626_v24, 0.0 }
 0x20b   : > { %v631_v28 = vmul.f32 %v630_v25, %v629_v27 }
 0x20d   : > { %v634_v30 = vpop.permute.xlu1 %633  ;;  %v632_v32 = vadd.f32 %v631_v28, %v624_v23 }
 0x20e   : > { %v637_v31 = vsel %vm636_vm3, %v634_v30, 0.0 }
 0x20f   : > { %v639_v33 = vmul.f32 %v638_v29, %v637_v31 }
 0x211   : > { %v640_v34 = vadd.f32 %v639_v33, %v632_v32 }
 0x213   : > { %v763_v35 = vmul.f32 -1.442695, %v640_v34 }
 0x215   : > { %851 = vpow2.f32 %v763_v35 }
 0x21f   : > { %v852_v14 = vpop.eup %851 }
 0x220   : > { %v644_v36 = vadd.f32 1.0, %v852_v14 }
 0x222   : > { %853 = vrcp.f32 %v644_v36 }
 0x22c   : > { %v854_v37 = vpop.eup %853 }
 0x22d   : > { %647 = vst.msk [vmem:[%s188_s5] sm:$0x1] %vm194_vm0, %v854_v37 }
 0x22e   : > { %911 = shalt.err (!%p908_p12)
}
 0x22f   : > { %s912_s7 = scalar_lea.hbm %s1261_s27, 16  ;;  %s916_s18 = scalar_lea.hbm %s1313_s2, 32 }
 0x230   : > { %p913_p4 = scmp.ne.s32.totalorder %s1261_s27, %s912_s7  ;;  %p917_p5 = scmp.lt.u32.totalorder %s1261_s27, %s1313_s2 }
 0x231   : > { %p918_p9 = scmp.lt.u32.totalorder %s916_s18, %s912_s7  ;;  %p920_p8 = scmp.lt.u32.totalorder %s912_s7, %s1261_s27 }
 0x232   : > { %p914_p10 = pnand %p913_p4, %p1326_p13 }
 0x233   : > { %p919_p3 = por %p918_p9, %p917_p5 }
 0x234   : > { %p915_p11 = pneg %p914_p10 }
 0x235   : > { %p921_p0 = por %p920_p8, %p919_p3 }
 0x237   : > { %p922_p2 = pnand %p921_p0, %p915_p11 }
 0x239   : > { %925 = shalt.err (!%p922_p2)
}
 0x23a   : > { %774 = dma.vmem_to_hbm [thread:$0]  (%p1326_p13), %s1263_s16, 16, %s1261_s27, %s649_s28  }
 0x23b PF: > { %s673_s24 = sand.u32 1, %s964_s9   ;;  %p1327_p6 = scmp.ne.s32.totalorder %s1321_s21, 0 }
 0x23c   : > { %p1328_p1 = scmp.ge.s32.totalorder %s984_s14, 2  ;;  %s674_s29 = scalar_lea.sflag [#allocation7], %s673_s24 }
 0x23e   : > { %p785_p7 = pnand %p1328_p1, %p1327_p6 }
 0x240   : > { %959 = dma.done.wait (!%p785_p7), %s674_s29, 16  }
 0x241   : > { %961 = vsyncadd (!%p785_p7), %s674_s29, 4294967280  ;;  %s19_s14 = sadd.s32 1, %s984_s14   ;;  %s1329_s9 = smov %s968_s10 }
 0x242   : > { %p16_p12 = scmp.ge.s32.totalorder %s19_s14, 4   ;;  %s1330_s10 = smov %s972_s11 }
 0x243   : > { %s1331_s11 = smov %s1113_s4  ;;  %s1332_s12 = smov %s980_s13 }
 0x244   : > { %s1333_s13 = smov %s1335_s25  ;;  %18 = sbr.rel (!%p16_p12) target bundleno = 7 (0x7), region = 86 }
 0x24b   :  { %678 = vsyncpa [#allocation6], 1 }
 0x24c   :  { %680 = vsyncpa [#allocation6 + $0x1], 1 }
 0x24d   :  { %681 = vsyncpa [#allocation7], 1 }
 0x24e   :  { %683 = vsyncpa [#allocation7 + $0x1], 1 }
 0x24f   :  { %684 = vsyncpa [#allocation8], 1 }
 0x250   :  { %686 = vsyncpa [#allocation8 + $0x1], 1 }

</bundles_post_ra>
